<compile_context>
chip_gen: v6e
topology: v6e:2x2x1
jax: 0.10.0
libtpu: 0.0.40
codegen_flags: <defaults>
</compile_context>

<pallas_src>
import functools

import jax
import jax.numpy as jnp
from jax import lax
from jax.experimental import pallas as pl
from jax.experimental.pallas import tpu as pltpu

IN_DIM = 1
HID = 64
OUT_DIM = 1
NEG_SLOPE = 0.01  # nn.LeakyReLU() default

# LHS-transposed matmul: contract dim 0 of the (in, out) weight with dim 0 of
# the (in, batch) activation -> (out, batch). Native on the MXU.
_TN_DIMS = (((0,), (0,)), ((), ()))


def _leaky(h):
    # mul + max instead of cmp + select + mul; valid because 0 < slope < 1.
    return jnp.maximum(h, NEG_SLOPE * h)


def _round_up(n, m):
    return ((n + m - 1) // m) * m


def mlp_kernel(xt_ref, w1c_ref, b1c_ref, w2_ref, b2c_ref, w3_ref, b3c_ref,
               w4c_ref, b4_ref, ot_ref):
    """Transposed MLP: activations are (features, batch), batch on lanes."""
    xt = xt_ref[...]                                        # (1, bm)
    # Layer 1: Linear(1, 64). K=1 matmul == outer product -> VPU broadcast.
    h = _leaky(w1c_ref[...] * xt + b1c_ref[...])            # (HID, bm)
    # Layers 2-3: Linear(64, 64) as W^T @ h on the MXU (weights untransposed).
    h = _leaky(lax.dot_general(w2_ref[...], h, _TN_DIMS,
                               preferred_element_type=jnp.float32)
               + b2c_ref[...])
    h = _leaky(lax.dot_general(w3_ref[...], h, _TN_DIMS,
                               preferred_element_type=jnp.float32)
               + b3c_ref[...])
    # Layer 4: Linear(64, 1). N=1 matmul -> multiply + sublane reduce (VPU/XLU).
    y = jnp.sum(h * w4c_ref[...], axis=0, keepdims=True) + b4_ref[0, 0]
    ot_ref[...] = y.astype(ot_ref.dtype)                    # (1, bm)


@functools.partial(jax.jit, static_argnames=("bm",))
def nn_forward(x, params, *, bm=256):
    """Actor MLP forward pass. x: (B, IN_DIM) -> (B, OUT_DIM)."""
    B = x.shape[0]
    w1, b1, w2, b2, w3, b3, w4, b4 = params

    # (B, 1) -> (1, B): contiguous reshape (== transpose since IN_DIM == 1).
    # No pad/scatter HLOs; partial batch tiles are masked by Pallas.
    xt = x.reshape(IN_DIM, B)

    # Batch tiling: batch on the 128-lane axis. bm stays a multiple of 128;
    # for B >= 256 cap it so the grid has >= 2 steps (v7x megacore engages).
    lanes = _round_up(B, 128)
    bm = min(bm, lanes)
    if lanes >= 256:
        bm = min(bm, _round_up(lanes // 2, 128))
    grid = (pl.cdiv(B, bm),)

    # Row-vector params as columns for the (feature, batch) layout. These are
    # contiguous reshapes (not transposes); w2/w3/w4 are passed as-is.
    w1c = w1.reshape(HID, IN_DIM)
    b1c = b1.reshape(HID, 1)
    b2c = b2.reshape(HID, 1)
    b3c = b3.reshape(HID, 1)

    full = lambda i: (0, 0)          # parameters stay resident across steps
    in_specs = [
        pl.BlockSpec((IN_DIM, bm), lambda i: (0, i)),       # x tile, batch on lanes
        pl.BlockSpec(w1c.shape, full), pl.BlockSpec(b1c.shape, full),
        pl.BlockSpec(w2.shape, full), pl.BlockSpec(b2c.shape, full),
        pl.BlockSpec(w3.shape, full), pl.BlockSpec(b3c.shape, full),
        pl.BlockSpec(w4.shape, full),
        pl.BlockSpec(memory_space=pltpu.MemorySpace.SMEM),  # b4 scalar bias
    ]
    out_spec = pl.BlockSpec((OUT_DIM, bm), lambda i: (0, i))

    n_param = sum(int(p.size) for p in params)
    cost = pl.CostEstimate(
        flops=2 * grid[0] * bm * (IN_DIM * HID + 2 * HID * HID + HID * OUT_DIM),
        transcendentals=0,
        bytes_accessed=4 * (B * (IN_DIM + OUT_DIM) + n_param))

    ot = pl.pallas_call(
        mlp_kernel,
        out_shape=jax.ShapeDtypeStruct((OUT_DIM, B), x.dtype),
        grid_spec=pltpu.PrefetchScalarGridSpec(
            num_scalar_prefetch=0,
            grid=grid,
            in_specs=in_specs,
            out_specs=out_spec,
        ),
        compiler_params=pltpu.CompilerParams(
            dimension_semantics=("parallel",)),   # batch tiles shard on v7x megacore
        cost_estimate=cost,
    )(xt, w1c, b1c, w2, b2c, w3, b3c, w4, b4)

    # (1, B) -> (B, 1): contiguous reshape (== transpose since OUT_DIM == 1).
    return ot.reshape(B, OUT_DIM)


def init_params(key):
    """Deterministic synthetic parameters (shapes match the torch module)."""
    dims = [(IN_DIM, HID), (HID, HID), (HID, HID), (HID, OUT_DIM)]
    params = []
    for i, (din, dout) in enumerate(dims):
        kw, kb, key = jax.random.split(jax.random.fold_in(key, i), 3)
        bound = 1.0 / jnp.sqrt(jnp.float32(din))  # torch Linear init range
        w = jax.random.uniform(kw, (din, dout), jnp.float32, -bound, bound)
        b = jax.random.uniform(kb, (1, dout), jnp.float32, -bound, bound)
        params += [w, b]
    return tuple(params)


def reference_forward(x, params):
    w1, b1, w2, b2, w3, b3, w4, b4 = params
    h = _leaky(x @ w1 + b1)
    h = _leaky(h @ w2 + b2)
    h = _leaky(h @ w3 + b3)
    return h @ w4 + b4


if __name__ == "__main__":
    key = jax.random.PRNGKey(0)
    kx, kp = jax.random.split(key)
    B = 64
    x = jax.random.normal(kx, (B, IN_DIM), jnp.float32)
    params = init_params(kp)

    out = nn_forward(x, params)
    out = jax.block_until_ready(out)

    ref = reference_forward(x, params)
    assert out.shape == (B, OUT_DIM)
    assert jnp.allclose(out, ref, atol=1e-5, rtol=1e-5), "mismatch vs pure-JAX reference"
    print("KERNEL_OK")
</pallas_src>

<mosaic_0001>
module attributes {stable_mosaic.version = 11 : i64} {
  func.func @mlp_kernel(%arg0: i32, %arg1: memref<1x128xf32, #tpu.memory_space<vmem>>, %arg2: memref<64x1xf32, #tpu.memory_space<vmem>>, %arg3: memref<64x1xf32, #tpu.memory_space<vmem>>, %arg4: memref<64x64xf32, #tpu.memory_space<vmem>>, %arg5: memref<64x1xf32, #tpu.memory_space<vmem>>, %arg6: memref<64x64xf32, #tpu.memory_space<vmem>>, %arg7: memref<64x1xf32, #tpu.memory_space<vmem>>, %arg8: memref<64x1xf32, #tpu.memory_space<vmem>>, %arg9: memref<1x1xf32, #tpu.memory_space<smem>>, %arg10: memref<1x128xf32, #tpu.memory_space<vmem>>) attributes {dimension_semantics = [#tpu.dimension_semantics<parallel>], iteration_bounds = array<i64: 1>, scalar_prefetch = 0 : i64, scratch_operands = 0 : i64, tpu.core_type = #tpu.core_type<tc>, window_params = [{transform_indices = @transform_0, window_bounds = array<i64: 1, 128>}, {pipeline_mode = #tpu.pipeline_mode<synchronous>, transform_indices = @transform_1, window_bounds = array<i64: 64, 1>}, {pipeline_mode = #tpu.pipeline_mode<synchronous>, transform_indices = @transform_2, window_bounds = array<i64: 64, 1>}, {pipeline_mode = #tpu.pipeline_mode<synchronous>, transform_indices = @transform_3, window_bounds = array<i64: 64, 64>}, {pipeline_mode = #tpu.pipeline_mode<synchronous>, transform_indices = @transform_4, window_bounds = array<i64: 64, 1>}, {pipeline_mode = #tpu.pipeline_mode<synchronous>, transform_indices = @transform_5, window_bounds = array<i64: 64, 64>}, {pipeline_mode = #tpu.pipeline_mode<synchronous>, transform_indices = @transform_6, window_bounds = array<i64: 64, 1>}, {pipeline_mode = #tpu.pipeline_mode<synchronous>, transform_indices = @transform_7, window_bounds = array<i64: 64, 1>}, {transform_indices = @transform_8, window_bounds = array<i64: 1, 1>}, {transform_indices = @transform_9, window_bounds = array<i64: 1, 128>}]} {
    %c0 = arith.constant 0 : index
    %c0_0 = arith.constant 0 : index
    %0 = vector.load %arg1[%c0, %c0_0] : memref<1x128xf32, #tpu.memory_space<vmem>>, vector<1x128xf32>
    %c0_1 = arith.constant 0 : index
    %c0_2 = arith.constant 0 : index
    %1 = vector.load %arg2[%c0_1, %c0_2] : memref<64x1xf32, #tpu.memory_space<vmem>>, vector<64x1xf32>
    %2 = vector.broadcast %1 : vector<64x1xf32> to vector<64x128xf32>
    %3 = vector.broadcast %0 : vector<1x128xf32> to vector<64x128xf32>
    %4 = arith.mulf %2, %3 : vector<64x128xf32>
    %c0_3 = arith.constant 0 : index
    %c0_4 = arith.constant 0 : index
    %5 = vector.load %arg3[%c0_3, %c0_4] : memref<64x1xf32, #tpu.memory_space<vmem>>, vector<64x1xf32>
    %6 = vector.broadcast %5 : vector<64x1xf32> to vector<64x128xf32>
    %7 = arith.addf %4, %6 : vector<64x128xf32>
    %cst = arith.constant 0.00999999977 : f32
    %8 = vector.broadcast %cst : f32 to vector<64x128xf32>
    %9 = arith.mulf %8, %7 : vector<64x128xf32>
    %10 = arith.maximumf %7, %9 : vector<64x128xf32>
    %c0_5 = arith.constant 0 : index
    %c0_6 = arith.constant 0 : index
    %11 = vector.load %arg4[%c0_5, %c0_6] : memref<64x64xf32, #tpu.memory_space<vmem>>, vector<64x64xf32>
    %cst_7 = arith.constant dense<0.000000e+00> : vector<64x128xf32>
    %12 = tpu.matmul %11, %10, %cst_7 {dimension_numbers = #tpu.dot_dimension_numbers<[0], [0], [1], [1], [0, 1, 1, 1], [], []>} : vector<64x64xf32>, vector<64x128xf32>, vector<64x128xf32> -> vector<64x128xf32>
    %c0_8 = arith.constant 0 : index
    %c0_9 = arith.constant 0 : index
    %13 = vector.load %arg5[%c0_8, %c0_9] : memref<64x1xf32, #tpu.memory_space<vmem>>, vector<64x1xf32>
    %14 = vector.broadcast %13 : vector<64x1xf32> to vector<64x128xf32>
    %15 = arith.addf %12, %14 : vector<64x128xf32>
    %cst_10 = arith.constant 0.00999999977 : f32
    %16 = vector.broadcast %cst_10 : f32 to vector<64x128xf32>
    %17 = arith.mulf %16, %15 : vector<64x128xf32>
    %18 = arith.maximumf %15, %17 : vector<64x128xf32>
    %c0_11 = arith.constant 0 : index
    %c0_12 = arith.constant 0 : index
    %19 = vector.load %arg6[%c0_11, %c0_12] : memref<64x64xf32, #tpu.memory_space<vmem>>, vector<64x64xf32>
    %cst_13 = arith.constant dense<0.000000e+00> : vector<64x128xf32>
    %20 = tpu.matmul %19, %18, %cst_13 {dimension_numbers = #tpu.dot_dimension_numbers<[0], [0], [1], [1], [0, 1, 1, 1], [], []>} : vector<64x64xf32>, vector<64x128xf32>, vector<64x128xf32> -> vector<64x128xf32>
    %c0_14 = arith.constant 0 : index
    %c0_15 = arith.constant 0 : index
    %21 = vector.load %arg7[%c0_14, %c0_15] : memref<64x1xf32, #tpu.memory_space<vmem>>, vector<64x1xf32>
    %22 = vector.broadcast %21 : vector<64x1xf32> to vector<64x128xf32>
    %23 = arith.addf %20, %22 : vector<64x128xf32>
    %cst_16 = arith.constant 0.00999999977 : f32
    %24 = vector.broadcast %cst_16 : f32 to vector<64x128xf32>
    %25 = arith.mulf %24, %23 : vector<64x128xf32>
    %26 = arith.maximumf %23, %25 : vector<64x128xf32>
    %c0_17 = arith.constant 0 : index
    %c0_18 = arith.constant 0 : index
    %27 = vector.load %arg8[%c0_17, %c0_18] : memref<64x1xf32, #tpu.memory_space<vmem>>, vector<64x1xf32>
    %28 = vector.broadcast %27 : vector<64x1xf32> to vector<64x128xf32>
    %29 = arith.mulf %26, %28 : vector<64x128xf32>
    %cst_19 = arith.constant dense<0.000000e+00> : vector<128xf32>
    %30 = vector.multi_reduction <add>, %29, %cst_19 [0] : vector<64x128xf32> to vector<128xf32>
    %31 = vector.shape_cast %30 : vector<128xf32> to vector<1x128xf32>
    %c0_20 = arith.constant 0 : index
    %c0_21 = arith.constant 0 : index
    %32 = memref.load %arg9[%c0_20, %c0_21] : memref<1x1xf32, #tpu.memory_space<smem>>
    %33 = vector.broadcast %32 : f32 to vector<1x128xf32>
    %34 = arith.addf %31, %33 : vector<1x128xf32>
    %c0_22 = arith.constant 0 : index
    %c0_23 = arith.constant 0 : index
    %35 = vector.load %arg10[%c0_22, %c0_23] : memref<1x128xf32, #tpu.memory_space<vmem>>, vector<1x128xf32>
    tpu.vector_store %arg10[%c0_22, %c0_23], %34 {strides = array<i32>} : memref<1x128xf32, #tpu.memory_space<vmem>>, vector<1x128xf32>,
    return
  }
  func.func @transform_0(%arg0: i32) -> (i32, i32) {
    %c0_i32 = arith.constant 0 : i32
    %c0_i32_0 = arith.constant 0 : i32
    return %c0_i32, %arg0 : i32, i32
  }
  func.func @transform_1(%arg0: i32) -> (i32, i32) {
    %c0_i32 = arith.constant 0 : i32
    %c0_i32_0 = arith.constant 0 : i32
    %c0_i32_1 = arith.constant 0 : i32
    return %c0_i32, %c0_i32_0 : i32, i32
  }
  func.func @transform_2(%arg0: i32) -> (i32, i32) {
    %c0_i32 = arith.constant 0 : i32
    %c0_i32_0 = arith.constant 0 : i32
    %c0_i32_1 = arith.constant 0 : i32
    return %c0_i32, %c0_i32_0 : i32, i32
  }
  func.func @transform_3(%arg0: i32) -> (i32, i32) {
    %c0_i32 = arith.constant 0 : i32
    %c0_i32_0 = arith.constant 0 : i32
    %c0_i32_1 = arith.constant 0 : i32
    return %c0_i32, %c0_i32_0 : i32, i32
  }
  func.func @transform_4(%arg0: i32) -> (i32, i32) {
    %c0_i32 = arith.constant 0 : i32
    %c0_i32_0 = arith.constant 0 : i32
    %c0_i32_1 = arith.constant 0 : i32
    return %c0_i32, %c0_i32_0 : i32, i32
  }
  func.func @transform_5(%arg0: i32) -> (i32, i32) {
    %c0_i32 = arith.constant 0 : i32
    %c0_i32_0 = arith.constant 0 : i32
    %c0_i32_1 = arith.constant 0 : i32
    return %c0_i32, %c0_i32_0 : i32, i32
  }
  func.func @transform_6(%arg0: i32) -> (i32, i32) {
    %c0_i32 = arith.constant 0 : i32
    %c0_i32_0 = arith.constant 0 : i32
    %c0_i32_1 = arith.constant 0 : i32
    return %c0_i32, %c0_i32_0 : i32, i32
  }
  func.func @transform_7(%arg0: i32) -> (i32, i32) {
    %c0_i32 = arith.constant 0 : i32
    %c0_i32_0 = arith.constant 0 : i32
    %c0_i32_1 = arith.constant 0 : i32
    return %c0_i32, %c0_i32_0 : i32, i32
  }
  func.func @transform_8(%arg0: i32) -> (i32, i32) {
    %c0_i32 = arith.constant 0 : i32
    %c0_i32_0 = arith.constant 0 : i32
    %c0_i32_1 = arith.constant 0 : i32
    return %c0_i32, %c0_i32_0 : i32, i32
  }
  func.func @transform_9(%arg0: i32) -> (i32, i32) {
    %c0_i32 = arith.constant 0 : i32
    %c0_i32_0 = arith.constant 0 : i32
    return %c0_i32, %arg0 : i32, i32
  }
}

</mosaic_0001>

<bundles_post_ra>
// kernel: nn_forward.1
= control target key start
LH: loop header
LB: loop body
LE: loop exit
PB: predicated region body
PF: predicated region fallthrough
CT: control target
= control target key end

     0   :  { %v855_v2 = vmov 0   ;;  %s1100_s0 = inlined_call_operand.vmem [shape: f32[1,64], index: 0, kind: input, shape index: {}]   ;;  %s1101_s1 = inlined_call_operand.vmem [shape: f32[64,1], index: 1, kind: input, shape index: {}]   ;;  %s1102_s2 = inlined_call_operand.vmem [shape: f32[64,1], index: 2, kind: input, shape index: {}]   ;;  %s1103_s3 = inlined_call_operand.vmem [shape: f32[64,64], index: 3, kind: input, shape index: {}]   ;;  %s1104_s4 = inlined_call_operand.vmem [shape: f32[64,1], index: 4, kind: input, shape index: {}]   ;;  %s1105_s5 = inlined_call_operand.vmem [shape: f32[64,64], index: 5, kind: input, shape index: {}]   ;;  %s1106_s6 = inlined_call_operand.vmem [shape: f32[64,1], index: 6, kind: input, shape index: {}]   ;;  %s1107_s7 = inlined_call_operand.vmem [shape: f32[64,1], index: 7, kind: input, shape index: {}]   ;;  %s1108_s8 = inlined_call_operand.<no memory space> [shape: f32[1,1], index: 8, kind: input, shape index: {}]   ;;  %s1109_s9 = inlined_call_operand.hbm [shape: f32[1,64], index: 9, kind: output, shape index: {}]  }
   0x1   :  { %v104_v0 = vld [vmem:[%s1102_s2 + $0x38] sm:$0xff]  ;;  %832 = vset.pattern.permute.xlu1 %v855_v2  ;;  %831 = vset.pattern.permute.xlu0 %v855_v2  ;;  %v41_v3 = vld [vmem:[%s1101_s1 + $0x30] sm:$0xff]  ;;  %v40_v4 = vld [vmem:[%s1101_s1 + $0x28] sm:$0xff] }
   0x2   :  { %v42_v1 = vld [vmem:[%s1101_s1 + $0x38] sm:$0xff]  ;;  %142 = vperm.xlu1 %832, %v104_v0   ;;  %v103_v5 = vld [vmem:[%s1102_s2 + $0x30] sm:$0xff]  ;;  %v39_v6 = vld [vmem:[%s1101_s1 + $0x20] sm:$0xff] }
   0x3   :  { %80 = vperm.xlu0 %831, %v42_v1   ;;  %v102_v7 = vld [vmem:[%s1102_s2 + $0x28] sm:$0xff]  ;;  %v38_v8 = vld [vmem:[%s1101_s1 + $0x18] sm:$0xff]  ;;  %v101_v9 = vld [vmem:[%s1102_s2 + $0x20] sm:$0xff] }
   0x4   :  { %v37_v10 = vld [vmem:[%s1101_s1 + $0x10] sm:$0xff] }
   0x6   :  { %70 = vperm.xlu1 %832, %v40_v4  }
   0x7   :  { %75 = vperm.xlu0 %831, %v41_v3  }
   0xa   :  { %65 = vperm.xlu1 %832, %v39_v6  }
   0xb   :  { %137 = vperm.xlu0 %831, %v103_v5  }
   0xe   :  { %60 = vperm.xlu1 %832, %v38_v8  }
   0xf   :  { %132 = vperm.xlu0 %831, %v102_v7  }
  0x10   :  { %15 = vsyncpa [#allocation4], 0  ;;  %v100_v11 = vld [vmem:[%s1102_s2 + $0x18] sm:$0xff]  ;;  %v36_v12 = vld [vmem:[%s1101_s1 + $0x8] sm:$0xff]  ;;  %vm257_vm0 = vcmask 523264   ;;  %s856_s24 = smov [#allocation3]  }
  0x11   :  { %v99_v13 = vld [vmem:[%s1102_s2 + $0x10] sm:$0xff]  ;;  %v35_v14 = vld [vmem:[%s1101_s1] sm:$0xff]  ;;  %v98_v15 = vld [vmem:[%s1102_s2 + $0x8] sm:$0xff] }
  0x12   :  { %55 = vperm.xlu1 %832, %v37_v10   ;;  %v97_v16 = vld [vmem:[%s1102_s2] sm:$0xff]  ;;  %v184_v17 = vld [vmem:[%s1104_s4 + $0x38] sm:$0xff]  ;;  %v183_v18 = vld [vmem:[%s1104_s4 + $0x30] sm:$0xff] }
  0x13   :  { %127 = vperm.xlu0 %831, %v101_v9   ;;  %v182_v19 = vld [vmem:[%s1104_s4 + $0x28] sm:$0xff]  ;;  %v181_v20 = vld [vmem:[%s1104_s4 + $0x20] sm:$0xff]  ;;  %v180_v21 = vld [vmem:[%s1104_s4 + $0x18] sm:$0xff] }
  0x14   :  { %v179_v22 = vld [vmem:[%s1104_s4 + $0x10] sm:$0xff]  ;;  %v178_v23 = vld [vmem:[%s1104_s4 + $0x8] sm:$0xff]  ;;  %v169_v24 = vld [vmem:[%s1103_s3] sm:$0xff] }
  0x15   :  { %v177_v25 = vld [vmem:[%s1104_s4] sm:$0xff]  ;;  %v170_v26 = vld [vmem:[%s1103_s3 + $0x8] sm:$0xff]  ;;  %v171_v27 = vld [vmem:[%s1103_s3 + $0x10] sm:$0xff] }
  0x16   :  { %50 = vperm.xlu1 %832, %v36_v12   ;;  %v172_v28 = vld [vmem:[%s1103_s3 + $0x18] sm:$0xff]  ;;  %v173_v29 = vld [vmem:[%s1103_s3 + $0x20] sm:$0xff]  ;;  %v174_v30 = vld [vmem:[%s1103_s3 + $0x28] sm:$0xff] }
  0x17   :  { %122 = vperm.xlu0 %831, %v100_v11   ;;  %v175_v31 = vld [vmem:[%s1103_s3 + $0x30] sm:$0xff]  ;;  %v176_v32 = vld [vmem:[%s1103_s3 + $0x38] sm:$0xff]  ;;  %v403_v33 = vld [vmem:[%s1105_s5] sm:$0xff] }
  0x18   :  { %v404_v34 = vld [vmem:[%s1105_s5 + $0x8] sm:$0xff]  ;;  %v405_v35 = vld [vmem:[%s1105_s5 + $0x10] sm:$0xff]  ;;  %v406_v36 = vld [vmem:[%s1105_s5 + $0x18] sm:$0xff] }
  0x19   :  { %v407_v37 = vld [vmem:[%s1105_s5 + $0x20] sm:$0xff]  ;;  %v408_v38 = vld [vmem:[%s1105_s5 + $0x28] sm:$0xff]  ;;  %v409_v40 = vld [vmem:[%s1105_s5 + $0x30] sm:$0xff] }
  0x1a   :  { %45 = vperm.xlu1 %832, %v35_v14   ;;  %v723_v39 = vld [vmem:[%s1100_s0] ss:$0 sm:$0xff]  ;;  %v410_v46 = vld [vmem:[%s1105_s5 + $0x38] sm:$0xff]  ;;  %v412_v49 = vld [vmem:[%s1106_s6 + $0x8] sm:$0xff]  ;;  %s715_s5 = sshll.u32 %s856_s24, 4  ;;  %s716_s5 = int_to_ptr.vmem [resolvable:$true] %s715_s5 }
  0x1b   :  { %117 = vperm.xlu0 %831, %v99_v13   ;;  %v411_v44 = vld [vmem:[%s1106_s6] sm:$0xff]  ;;  %v414_v57 = vld [vmem:[%s1106_s6 + $0x18] sm:$0xff]  ;;  %v637_v14 = vld [vmem:[%s1107_s7 + $0x8] sm:$0xff]  ;;  %s833_s25 = scalar_lea.vmem %s716_s5, 16  ;;  %s837_s26 = scalar_lea.vmem %s716_s5, 32 }
  0x1c   :  { %v415_v0 = vld [vmem:[%s1106_s6 + $0x20] sm:$0xff]  ;;  %p834_p0 = scmp.ne.s32.totalorder %s716_s5, %s833_s25  ;;  %p838_p1 = scmp.lt.s32.totalorder %s716_s5, %s716_s5 }
  0x1d   :  { %v636_v7 = vld [vmem:[%s1107_s7] sm:$0xff]  ;;  %p839_p2 = scmp.lt.s32.totalorder %s837_s26, %s833_s25 }
  0x1e   :  { %107 = vperm.xlu1 %832, %v97_v16  }
  0x1f   :  { %112 = vperm.xlu0 %831, %v98_v15   ;;  %p840_p3 = por %p839_p2, %p838_p1 }
  0x21   :  { %p841_p4 = pnand %p840_p3, %p834_p0 }
  0x22   :  { %222 = vperm.xlu1 %832, %v184_v17  }
  0x26   :  { %217 = vperm.xlu1 %832, %v183_v18  }
  0x2a   :  { %212 = vperm.xlu1 %832, %v182_v19  }
  0x2e   :  { %207 = vperm.xlu1 %832, %v181_v20  }
  0x32   :  { %202 = vperm.xlu1 %832, %v180_v21  }
  0x36   :  { %197 = vperm.xlu1 %832, %v179_v22   ;;  %v416_v22 = vld [vmem:[%s1106_s6 + $0x28] sm:$0xff] }
  0x3a   :  { %192 = vperm.xlu1 %832, %v178_v23  }
  0x3d   :  { %225 = vxpose.xlu0.b32.start [1/8] (short) (narrow) %v169_v24, 64 }
  0x3e   :  { %187 = vperm.xlu1 %832, %v177_v25  }
  0x41   :  { %226 = vxpose.xlu0.b32.cont [2/8] (short) (narrow) %v170_v26, 64 }
  0x45   :  { %227 = vxpose.xlu0.b32.cont [3/8] (short) (narrow) %v171_v27, 64 }
  0x49   :  { %228 = vxpose.xlu0.b32.cont [4/8] (short) (narrow) %v172_v28, 64 }
  0x4d   :  { %229 = vxpose.xlu0.b32.cont [5/8] (short) (narrow) %v173_v29, 64  ;;  %v638_v29 = vld [vmem:[%s1107_s7 + $0x10] sm:$0xff] }
  0x51   :  { %230 = vxpose.xlu0.b32.cont [6/8] (short) (narrow) %v174_v30, 64 }
  0x55   :  { %231 = vxpose.xlu0.b32.cont [7/8] (short) (narrow) %v175_v31, 64 }
  0x59   :  { %232 = vxpose.xlu0.b32.end [8/8] (short) (narrow) %v176_v32, 64 }
  0x67   :  { %459 = vxpose.xlu1.b32.start [1/8] (short) (narrow) %v403_v33, 64  ;;  %v417_v33 = vld [vmem:[%s1106_s6 + $0x30] sm:$0xff] }
  0x6b   :  { %460 = vxpose.xlu1.b32.cont [2/8] (short) (narrow) %v404_v34, 64  ;;  %v413_v34 = vld [vmem:[%s1106_s6 + $0x10] sm:$0xff] }
  0x6f   :  { %461 = vxpose.xlu1.b32.cont [3/8] (short) (narrow) %v405_v35, 64 }
  0x73   :  { %462 = vxpose.xlu1.b32.cont [4/8] (short) (narrow) %v406_v36, 64  ;;  %v639_v36 = vld [vmem:[%s1107_s7 + $0x18] sm:$0xff] }
  0x77   :  { %463 = vxpose.xlu1.b32.cont [5/8] (short) (narrow) %v407_v37, 64  ;;  %v418_v37 = vld [vmem:[%s1106_s6 + $0x38] sm:$0xff] }
  0x7b   :  { %464 = vxpose.xlu1.b32.cont [6/8] (short) (narrow) %v408_v38, 64  ;;  %v640_v38 = vld [vmem:[%s1107_s7 + $0x20] sm:$0xff] }
  0x7d   :  { %v143_v41 = vpop.permute.xlu1 %142 }
  0x7e   :  { %v81_v42 = vpop.permute.xlu0 %80 }
  0x7f   :  { %v96_v43 = vmul.f32 %v723_v39, %v81_v42  ;;  %465 = vxpose.xlu1.b32.cont [7/8] (short) (narrow) %v409_v40, 64  ;;  %v642_v40 = vld [vmem:[%s1107_s7 + $0x30] sm:$0xff] }
  0x81   :  { %v152_v45 = vadd.f32 %v143_v41, %v96_v43  ;;  %v71_v48 = vpop.permute.xlu1 %70  ;;  %v643_v41 = vld [vmem:[%s1107_s7 + $0x38] sm:$0xff] }
  0x82   :  { %421 = vperm.xlu0 %831, %v411_v44   ;;  %v76_v47 = vpop.permute.xlu0 %75  ;;  %v94_v55 = vmul.f32 %v723_v39, %v71_v48 }
  0x83   :  { %v160_v50 = vmul.f32 0.01, %v152_v45  ;;  %466 = vxpose.xlu1.b32.end [8/8] (short) (narrow) %v410_v46, 64  ;;  %v95_v51 = vmul.f32 %v723_v39, %v76_v47 }
  0x85   :  { %v168_v52 = vmax.f32 %v152_v45, %v160_v50  ;;  %v66_v54 = vpop.permute.xlu1 %65 }
  0x86   :  { %426 = vperm.xlu0 %831, %v412_v49   ;;  %v138_v53 = vpop.permute.xlu0 %137  ;;  %v93_v62 = vmul.f32 %v723_v39, %v66_v54 }
  0x87   :  { %v151_v56 = vadd.f32 %v138_v53, %v95_v51  ;;  %772 = vmatprep.subr.mxu0 %v168_v52 }
  0x88   :  { %773 = vmatpush3.msra.mxu0 %v168_v52 }
  0x89   :  { %v159_v58 = vmul.f32 0.01, %v151_v56  ;;  %v61_v60 = vpop.permute.xlu1 %60 }
  0x8a   :  { %436 = vperm.xlu0 %831, %v414_v57   ;;  %v133_v59 = vpop.permute.xlu0 %132  ;;  %v92_v5 = vmul.f32 %v723_v39, %v61_v60 }
  0x8b   :  { %v167_v61 = vmax.f32 %v151_v56, %v159_v58  ;;  %v150_v63 = vadd.f32 %v133_v59, %v94_v55 }
  0x8d   :  { %v158_v1 = vmul.f32 0.01, %v150_v63  ;;  %774 = vmatprep.subr.mxu0 %v167_v61  ;;  %v56_v3 = vpop.permute.xlu1 %55 }
  0x8e   :  { %441 = vperm.xlu0 %831, %v415_v0   ;;  %v128_v2 = vpop.permute.xlu0 %127  ;;  %775 = vmatpush3.msra.mxu0 %v167_v61  ;;  %v91_v12 = vmul.f32 %v723_v39, %v56_v3 }
  0x8f   :  { %v166_v4 = vmax.f32 %v150_v63, %v158_v1  ;;  %v149_v6 = vadd.f32 %v128_v2, %v93_v62 }
  0x91   :  { %v157_v8 = vmul.f32 0.01, %v149_v6  ;;  %776 = vmatprep.subr.mxu0 %v166_v4  ;;  %v51_v10 = vpop.permute.xlu1 %50 }
  0x92   :  { %646 = vperm.xlu0 %831, %v636_v7   ;;  %v123_v9 = vpop.permute.xlu0 %122  ;;  %777 = vmatpush3.msra.mxu0 %v166_v4  ;;  %v90_v19 = vmul.f32 %v723_v39, %v51_v10 }
  0x93   :  { %v165_v11 = vmax.f32 %v149_v6, %v157_v8  ;;  %v148_v13 = vadd.f32 %v123_v9, %v92_v5 }
  0x95   :  { %v156_v15 = vmul.f32 0.01, %v148_v13  ;;  %778 = vmatprep.subr.mxu0 %v165_v11  ;;  %v46_v17 = vpop.permute.xlu1 %45 }
  0x96   :  { %651 = vperm.xlu0 %831, %v637_v14   ;;  %v118_v16 = vpop.permute.xlu0 %117  ;;  %779 = vmatpush3.msra.mxu0 %v165_v11  ;;  %v89_v21 = vmul.f32 %v723_v39, %v46_v17  ;;  %v641_v39 = vld [vmem:[%s1107_s7 + $0x28] sm:$0xff] }
  0x97   :  { %v164_v18 = vmax.f32 %v148_v13, %v156_v15  ;;  %v147_v20 = vadd.f32 %v118_v16, %v91_v12 }
  0x99   :  { %v155_v23 = vmul.f32 0.01, %v147_v20  ;;  %780 = vmatprep.subr.mxu0 %v164_v18  ;;  %v108_v25 = vpop.permute.xlu1 %107 }
  0x9a   :  { %446 = vperm.xlu0 %831, %v416_v22   ;;  %v113_v24 = vpop.permute.xlu0 %112  ;;  %781 = vmatpush3.msra.mxu0 %v164_v18  ;;  %v145_v28 = vadd.f32 %v108_v25, %v89_v21 }
  0x9b   :  { %v163_v26 = vmax.f32 %v147_v20, %v155_v23  ;;  %v146_v27 = vadd.f32 %v113_v24, %v90_v19 }
  0x9c   :  { %v153_v31 = vmul.f32 0.01, %v145_v28 }
  0x9d   :  { %v154_v30 = vmul.f32 0.01, %v146_v27  ;;  %782 = vmatprep.subr.mxu0 %v163_v26  ;;  %v223_v42 = vpop.permute.xlu1 %222 }
  0x9e   :  { %656 = vperm.xlu0 %831, %v638_v29   ;;  %783 = vmatpush3.msra.mxu0 %v163_v26  ;;  %v161_v35 = vmax.f32 %v145_v28, %v153_v31 }
  0x9f   :  { %v162_v32 = vmax.f32 %v146_v27, %v154_v30 }
  0xa1   :  { %784 = vmatprep.subr.mxu0 %v162_v32  ;;  %431 = vperm.xlu1 %832, %v413_v34   ;;  %v218_v44 = vpop.permute.xlu1 %217 }
  0xa2   :  { %451 = vperm.xlu0 %831, %v417_v33   ;;  %785 = vmatpush3.msra.mxu0 %v162_v32 }
  0xa3   :  { %786 = vmatprep.subr.mxu0 %v161_v35 }
  0xa4   :  { %787 = vmatpush3.msra.mxu0 %v161_v35 }
  0xa5   :  { %456 = vperm.xlu1 %832, %v418_v37   ;;  %v213_v47 = vpop.permute.xlu1 %212 }
  0xa6   :  { %661 = vperm.xlu0 %831, %v639_v36  }
  0xa9   :  { %671 = vperm.xlu1 %832, %v641_v39   ;;  %v208_v49 = vpop.permute.xlu1 %207 }
  0xaa   :  { %666 = vperm.xlu0 %831, %v640_v38  }
  0xad   :  { %681 = vperm.xlu1 %832, %v643_v41   ;;  %v203_v52 = vpop.permute.xlu1 %202 }
  0xae   :  { %676 = vperm.xlu0 %831, %v642_v40  }
  0xb1   :  { %v198_v54 = vpop.permute.xlu1 %197 }
  0xb5   :  { %v193_v56 = vpop.permute.xlu1 %192 }
  0xb9   :  { %v241_v43 = vpop.trf.xlu0  ;;  %v188_v57 = vpop.permute.xlu1 %187 }
  0xba   :  { %788 = vmatprep.mubr.msk.f32.mxu0 %vm257_vm0, %v241_v43 }
  0xbd   :  { %v242_v45 = vpop.trf.xlu0 }
  0xbe   :  { %789 = vmatmul.mubr.msk.f32.vlgmr.msra.gmra.mxu0 %vm257_vm0, %v242_v45 }
  0xc1   :  { %v243_v46 = vpop.trf.xlu0 }
  0xc2   :  { %791 = vmatprep.mubr.msk.f32.mxu0 %vm257_vm0, %v243_v46 }
  0xc5   :  { %v244_v48 = vpop.trf.xlu0 }
  0xc6   :  { %792 = vmatmul.mubr.msk.f32.gmra.mxu0 %vm257_vm0, %v244_v48 }
  0xc9   :  { %v245_v50 = vpop.trf.xlu0 }
  0xca   :  { %794 = vmatprep.mubr.msk.f32.mxu0 %vm257_vm0, %v245_v50 }
  0xcd   :  { %v246_v51 = vpop.trf.xlu0 }
  0xce   :  { %795 = vmatmul.mubr.msk.f32.gmra.mxu0 %vm257_vm0, %v246_v51 }
  0xd1   :  { %v247_v53 = vpop.trf.xlu0 }
  0xd2   :  { %797 = vmatprep.mubr.msk.f32.mxu0 %vm257_vm0, %v247_v53 }
  0xd5   :  { %v248_v55 = vpop.trf.xlu0 }
  0xd6   :  { %798 = vmatmul.mubr.msk.f32.gmra.mxu0 %vm257_vm0, %v248_v55 }
  0xe3   :  { %v475_v58 = vpop.trf.xlu1 }
  0xe4   :  { %816 = vmatprep.mubr.msk.f32.mxu1 %vm257_vm0, %v475_v58 }
  0xe7   :  { %v476_v0 = vpop.trf.xlu1 }
  0xeb   :  { %v477_v9 = vpop.trf.xlu1 }
  0xef   :  { %v478_v20 = vpop.trf.xlu1 }
  0xf3   :  { %v479_v28 = vpop.trf.xlu1 }
  0xf7   :  { %v480_v31 = vpop.trf.xlu1 }
  0xfb   :  { %v481_v32 = vpop.trf.xlu1 }
  0xfd   :  { %v422_v34 = vpop.permute.xlu0 %421 }
  0xff   :  { %v482_v33 = vpop.trf.xlu1 }
 0x101   :  { %v427_v35 = vpop.permute.xlu0 %426 }
 0x105   :  { %v437_v36 = vpop.permute.xlu0 %436 }
 0x109   :  { %v442_v37 = vpop.permute.xlu0 %441 }
 0x10d   :  { %v647_v38 = vpop.permute.xlu0 %646 }
 0x111   :  { %v652_v39 = vpop.permute.xlu0 %651 }
 0x115   :  { %v447_v40 = vpop.permute.xlu0 %446 }
 0x119   :  { %v657_v41 = vpop.permute.xlu0 %656 }
 0x17e   :  { %v790_v59 = vpop.f32.mrf.mxu0 }
 0x17f   :  { %v354_v17 = vadd.f32 %v790_v59, %v193_v56 }
 0x180   :  { %v348_v60 = vpop.f32.mrf.mxu0 }
 0x181   :  { %v349_v21 = vadd.f32 %v348_v60, %v188_v57  ;;  %v388_v24 = vmul.f32 0.01, %v354_v17 }
 0x183   :  { %v387_v26 = vmul.f32 0.01, %v349_v21  ;;  %v396_v29 = vmax.f32 %v354_v17, %v388_v24 }
 0x185   :  { %v395_v30 = vmax.f32 %v349_v21, %v387_v26 }
 0x186   :  { %v793_v61 = vpop.f32.mrf.mxu0 }
 0x187   :  { %v364_v10 = vadd.f32 %v793_v61, %v203_v52 }
 0x188   :  { %v358_v62 = vpop.f32.mrf.mxu0 }
 0x189   :  { %v359_v14 = vadd.f32 %v358_v62, %v198_v54  ;;  %v390_v18 = vmul.f32 0.01, %v364_v10 }
 0x18b   :  { %v389_v22 = vmul.f32 0.01, %v359_v14  ;;  %v398_v25 = vmax.f32 %v364_v10, %v390_v18 }
 0x18d   :  { %v397_v27 = vmax.f32 %v359_v14, %v389_v22 }
 0x18e   :  { %v796_v63 = vpop.f32.mrf.mxu0 }
 0x18f   :  { %v374_v3 = vadd.f32 %v796_v63, %v213_v47 }
 0x190   :  { %v368_v1 = vpop.f32.mrf.mxu0 }
 0x191   :  { %v369_v6 = vadd.f32 %v368_v1, %v208_v49  ;;  %v392_v11 = vmul.f32 0.01, %v374_v3  ;;  %v432_v49 = vpop.permute.xlu1 %431 }
 0x193   :  { %v391_v15 = vmul.f32 0.01, %v369_v6  ;;  %v400_v19 = vmax.f32 %v374_v3, %v392_v11 }
 0x195   :  { %v399_v23 = vmax.f32 %v369_v6, %v391_v15  ;;  %v457_v63 = vpop.permute.xlu1 %456 }
 0x196   :  { %v799_v2 = vpop.f32.mrf.mxu0 }
 0x197   :  { %v384_v4 = vadd.f32 %v799_v2, %v223_v42 }
 0x198   :  { %v378_v5 = vpop.f32.mrf.mxu0 }
 0x199   :  { %v394_v7 = vmul.f32 0.01, %v384_v4  ;;  %v379_v8 = vadd.f32 %v378_v5, %v218_v44  ;;  %v452_v44 = vpop.permute.xlu0 %451  ;;  %v672_v18 = vpop.permute.xlu1 %671 }
 0x19b   :  { %v393_v12 = vmul.f32 0.01, %v379_v8  ;;  %v402_v13 = vmax.f32 %v384_v4, %v394_v7 }
 0x19d   :  { %v401_v16 = vmax.f32 %v379_v8, %v393_v12  ;;  %800 = vmatprep.subr.mxu1 %v402_v13  ;;  %v662_v57 = vpop.permute.xlu0 %661 }
 0x19e   :  { %801 = vmatpush3.msra.mxu1 %v402_v13 }
 0x19f   :  { %802 = vmatprep.subr.mxu1 %v401_v16 }
 0x1a0   :  { %803 = vmatpush3.msra.mxu1 %v401_v16 }
 0x1a1   :  { %804 = vmatprep.subr.mxu1 %v400_v19 }
 0x1a2   :  { %805 = vmatpush3.msra.mxu1 %v400_v19 }
 0x1a3   :  { %806 = vmatprep.subr.mxu1 %v399_v23 }
 0x1a4   :  { %807 = vmatpush3.msra.mxu1 %v399_v23 }
 0x1a5   :  { %808 = vmatprep.subr.mxu1 %v398_v25 }
 0x1a6   :  { %809 = vmatpush3.msra.mxu1 %v398_v25 }
 0x1a7   :  { %810 = vmatprep.subr.mxu1 %v397_v27 }
 0x1a8   :  { %811 = vmatpush3.msra.mxu1 %v397_v27 }
 0x1a9   :  { %812 = vmatprep.subr.mxu1 %v396_v29 }
 0x1aa   :  { %813 = vmatpush3.msra.mxu1 %v396_v29  ;;  %v682_v29 = vpop.permute.xlu1 %681 }
 0x1ab   :  { %814 = vmatprep.subr.mxu1 %v395_v30 }
 0x1ac   :  { %815 = vmatpush3.msra.mxu1 %v395_v30 }
 0x1ad   :  { %817 = vmatmul.mubr.msk.f32.vlgmr.msra.gmra.mxu1 %vm257_vm0, %v476_v0 }
 0x1ae   :  { %819 = vmatprep.mubr.msk.f32.mxu1 %vm257_vm0, %v477_v9  ;;  %v667_v9 = vpop.permute.xlu0 %666 }
 0x1b1   :  { %820 = vmatmul.mubr.msk.f32.gmra.mxu1 %vm257_vm0, %v478_v20 }
 0x1b2   :  { %822 = vmatprep.mubr.msk.f32.mxu1 %vm257_vm0, %v479_v28  ;;  %v677_v23 = vpop.permute.xlu0 %676 }
 0x1b5   :  { %823 = vmatmul.mubr.msk.f32.gmra.mxu1 %vm257_vm0, %v480_v31 }
 0x1b6   :  { %825 = vmatprep.mubr.msk.f32.mxu1 %vm257_vm0, %v481_v32 }
 0x1b9   :  { %826 = vmatmul.mubr.msk.f32.gmra.mxu1 %vm257_vm0, %v482_v33 }
 0x26d   :  { %v818_v42 = vpop.f32.mrf.mxu1 }
 0x26e   :  { %v587_v43 = vadd.f32 %v818_v42, %v427_v35 }
 0x26f   :  { %v581_v45 = vpop.f32.mrf.mxu1 }
 0x270   :  { %v621_v46 = vmul.f32 0.01, %v587_v43  ;;  %v582_v47 = vadd.f32 %v581_v45, %v422_v34 }
 0x271   :  { %v821_v48 = vpop.f32.mrf.mxu1 }
 0x272   :  { %v620_v50 = vmul.f32 0.01, %v582_v47  ;;  %v597_v51 = vadd.f32 %v821_v48, %v437_v36  ;;  %v629_v53 = vmax.f32 %v587_v43, %v621_v46 }
 0x273   :  { %v591_v52 = vpop.f32.mrf.mxu1 }
 0x274   :  { %v628_v54 = vmax.f32 %v582_v47, %v620_v50  ;;  %v623_v55 = vmul.f32 0.01, %v597_v51  ;;  %v592_v56 = vadd.f32 %v591_v52, %v432_v49  ;;  %v685_v0 = vmul.f32 %v652_v39, %v629_v53 }
 0x275   :  { %v824_v58 = vpop.f32.mrf.mxu1 }
 0x276   :  { %v684_v59 = vmul.f32 %v647_v38, %v628_v54  ;;  %v622_v60 = vmul.f32 0.01, %v592_v56  ;;  %v607_v61 = vadd.f32 %v824_v58, %v447_v40  ;;  %v631_v1 = vmax.f32 %v597_v51, %v623_v55 }
 0x277   :  { %v601_v62 = vpop.f32.mrf.mxu1  ;;  %v706_v38 = vstv %s1108_s8 }
 0x278   :  { %v630_v2 = vmax.f32 %v592_v56, %v622_v60  ;;  %v625_v3 = vmul.f32 0.01, %v607_v61  ;;  %v602_v4 = vadd.f32 %v601_v62, %v442_v37  ;;  %v692_v6 = vadd.f32 %v685_v0, %v684_v59 }
 0x279   :  { %v827_v5 = vpop.f32.mrf.mxu1  ;;  %v687_v12 = vmul.f32 %v662_v57, %v631_v1 }
 0x27a   :  { %v686_v7 = vmul.f32 %v657_v41, %v630_v2  ;;  %v617_v8 = vadd.f32 %v827_v5, %v457_v63  ;;  %v624_v10 = vmul.f32 0.01, %v602_v4  ;;  %v633_v15 = vmax.f32 %v607_v61, %v625_v3 }
 0x27b   :  { %v611_v11 = vpop.f32.mrf.mxu1 }
 0x27c   :  { %v693_v13 = vadd.f32 %v692_v6, %v686_v7  ;;  %v612_v14 = vadd.f32 %v611_v11, %v452_v44  ;;  %v632_v16 = vmax.f32 %v602_v4, %v624_v10  ;;  %v627_v17 = vmul.f32 0.01, %v617_v8 }
 0x27d   :  { %v689_v24 = vmul.f32 %v672_v18, %v633_v15 }
 0x27e   :  { %v694_v19 = vadd.f32 %v693_v13, %v687_v12  ;;  %v626_v20 = vmul.f32 0.01, %v612_v14  ;;  %v688_v21 = vmul.f32 %v667_v9, %v632_v16  ;;  %v635_v26 = vmax.f32 %v617_v8, %v627_v17 }
 0x280   :  { %v634_v22 = vmax.f32 %v612_v14, %v626_v20  ;;  %v695_v25 = vadd.f32 %v694_v19, %v688_v21  ;;  %v691_v30 = vmul.f32 %v682_v29, %v635_v26 }
 0x282   :  { %v690_v27 = vmul.f32 %v677_v23, %v634_v22  ;;  %v696_v28 = vadd.f32 %v695_v25, %v689_v24 }
 0x284   :  { %v697_v31 = vadd.f32 %v696_v28, %v690_v27 }
 0x286   :  { %v698_v32 = vadd.f32 %v697_v31, %v691_v30 }
 0x288   :  { %v699_v33 = vrot.slane %v698_v32, 4 }
 0x28a   :  { %v700_v34 = vadd.f32 %v699_v33, %v698_v32 }
 0x28c   :  { %v701_v35 = vrot.slane %v700_v34, 2 }
 0x28e   :  { %v702_v36 = vadd.f32 %v701_v35, %v700_v34 }
 0x290   :  { %v703_v37 = vrot.slane %v702_v36, 1 }
 0x292   :  { %v704_v39 = vadd.f32 %v703_v37, %v702_v36 }
 0x294   :  { %v707_v40 = vadd.f32 %v706_v38, %v704_v39 }
 0x296   :  { %708 = vst [vmem:[#allocation3] sm:$0x1] %v707_v40 }
 0x297   :  { %844 = shalt.err (!%p841_p4)
}
 0x298   :  { %718 = dma.vmem_to_hbm [thread:$0]  %s716_s5, 16, %s1109_s9, [#allocation4]  }
 0x299   :  { %853 = dma.done.wait [#allocation4], 16  }
 0x29a   :  { %854 = vsyncadd [#allocation4], 4294967280 }
 0x29b   :  { %722 = vsyncpa [#allocation4], 1 }

</bundles_post_ra>
